<compile_context>
chip_gen: v5e
topology: v5e:2x2
jax: 0.10.0
libtpu: 0.0.40
codegen_flags: <defaults>
</compile_context>

<pallas_src>
import functools

import jax
import jax.numpy as jnp
from jax.experimental import pallas as pl
from jax.experimental.pallas import tpu as pltpu

LANE = 128
SUBLANE = 8


def _round_up(v, m):
    return (v + m - 1) // m * m


# ----------------------------- Kernel A: segment-sum ----------------------------------------
def _aggregate_kernel(batch_ref, x_ref, part_ref, acc_ref, gids_ref, *, n_rows, dot_dtype):
    c = pl.program_id(0)                       # core / node-range split (parallel)
    t = pl.program_id(1)                       # tile within this core's range (arbitrary)
    tiles_per_core = pl.num_programs(1)
    tile_rows = x_ref.shape[0]

    @pl.when(t == 0)
    def _init():
        acc_ref[...] = jnp.zeros_like(acc_ref)
        # Loop-invariant graph-id iota, hoisted into scratch (computed once per core).
        gids_ref[...] = jax.lax.broadcasted_iota(jnp.int32, gids_ref.shape, 0)

    # Intended global row range of this tile; zero rows >= n_rows so garbage rows of a
    # partial tile (or a clamped duplicate tail tile) contribute exactly 0 (NaN-safe).
    row_start = (c * tiles_per_core + t) * tile_rows
    row_ids = row_start + jax.lax.broadcasted_iota(jnp.int32, (tile_rows, 1), 0)
    x_tile = jnp.where(row_ids < n_rows, x_ref[...], 0).astype(dot_dtype)

    # One-hot segment sum on the MXU, built directly as [B_pad, TILE] (no transpose).
    seg = batch_ref[...]                                        # [1, TILE] int32 (pad = -1)
    onehot = (gids_ref[...] == seg).astype(dot_dtype)           # [B_pad, TILE]
    acc_ref[...] += jnp.dot(onehot, x_tile, preferred_element_type=jnp.float32)

    @pl.when(t == tiles_per_core - 1)
    def _store():
        part_ref[...] = acc_ref[...].reshape(part_ref.shape)


# --------------------------- Kernel B: phi_u MLP + residual ----------------------------------
def _phi_u_kernel(part_ref, u_ref, w1x_ref, w1u_ref, b1_ref, w2_ref, b2_ref, out_ref):
    x_agg = jnp.sum(part_ref[...], axis=0)                      # combine per-core partials
    u_val = u_ref[...]
    # concat([x_agg, u]) @ W1 == x_agg @ W1_x + u @ W1_u  (no lane-dim concat needed)
    h = jnp.dot(x_agg, w1x_ref[...], preferred_element_type=jnp.float32)
    h = h + jnp.dot(u_val, w1u_ref[...], preferred_element_type=jnp.float32)
    h = jnp.maximum(h + b1_ref[...], 0.0)                       # ReLU
    out = jnp.dot(h, w2_ref[...], preferred_element_type=jnp.float32)
    out_ref[...] = (out + b2_ref[...] + u_val).astype(out_ref.dtype)


# --------------------------------- Python wrapper --------------------------------------------
def res_global_model_node_only(x, u, batch, params, *,
                               tile_rows=None, num_cores=2,
                               stream_dtype=jnp.float32):
    """x: [N, f_x], u: [B, f_u], batch: [N] int (values in [0, B))."""
    N, f_x = x.shape
    B, f_u = u.shape
    w1, b1, w2, b2 = params["w1"], params["b1"], params["w2"], params["b2"]
    hidden = w1.shape[1]
    assert w1.shape[0] == f_x + f_u
    assert w2.shape == (hidden, f_u), "residual (+ u) requires f_u_out == f_u"

    f32 = jnp.float32
    b_pad = _round_up(B, SUBLANE)

    # Tile sizing: ~1 MiB of x per DMA step, capped so one-hot / iota intermediates stay small.
    if tile_rows is None:
        row_bytes = f_x * jnp.dtype(stream_dtype).itemsize
        tile_rows = _round_up((1 << 20) // max(row_bytes, 1), LANE)
        tile_rows = min(tile_rows, 32768)
        tile_rows = min(tile_rows, max(1024, _round_up((2 << 20) // (4 * b_pad), LANE)))
        tile_rows = max(tile_rows, LANE)

    if N <= tile_rows:
        tile_n = _round_up(N, SUBLANE)          # single tile: block rows == (rounded) N
        ncores = 1
    else:
        tile_n = _round_up(tile_rows, LANE)     # multi-tile: lane-dim of batch blocks
        ncores = max(1, num_cores)
    n_tiles = pl.cdiv(N, tile_n)
    ncores = min(ncores, n_tiles)
    tiles_per_core = pl.cdiv(n_tiles, ncores)
    n_total = ncores * tiles_per_core * tile_n
    last_tile = n_tiles - 1

    # Only `batch` (4 B/node) is padded; x is streamed unpadded in both dims.
    batch_p = jnp.full((1, n_total), -1, jnp.int32).at[0, :N].set(batch.astype(jnp.int32))
    x_in = x.astype(stream_dtype)
    u_p = jnp.zeros((b_pad, f_u), f32).at[:B].set(u.astype(f32))

    # Split W1 into the x_agg half and the u half.
    w1x = w1[:f_x].astype(f32)
    w1u = w1[f_x:].astype(f32)
    b1_p = b1.reshape(1, hidden).astype(f32)
    w2_p = w2.astype(f32)
    b2_p = b2.reshape(1, f_u).astype(f32)

    # ---- Kernel A: per-core segment-sum partials over the streamed node axis. ----
    partials = pl.pallas_call(
        functools.partial(_aggregate_kernel, n_rows=N, dot_dtype=stream_dtype),
        out_shape=jax.ShapeDtypeStruct((ncores, b_pad, f_x), f32),
        grid_spec=pltpu.PrefetchScalarGridSpec(
            num_scalar_prefetch=0,
            grid=(ncores, tiles_per_core),
            in_specs=[
                # batch ids (streamed), indexed by the *intended* tile (pad value -1).
                pl.BlockSpec((1, tile_n), lambda c, t: (0, c * tiles_per_core + t)),
                # x stream at natural width; tail tiles past the array are clamped to the
                # last valid tile (their rows are zeroed by the in-kernel row mask).
                pl.BlockSpec((tile_n, f_x),
                             lambda c, t: (jnp.minimum(c * tiles_per_core + t, last_tile), 0)),
            ],
            out_specs=pl.BlockSpec((1, b_pad, f_x), lambda c, t: (c, 0, 0)),
            scratch_shapes=[
                pltpu.VMEM((b_pad, f_x), f32),            # per-core accumulator
                pltpu.VMEM((b_pad, tile_n), jnp.int32),   # hoisted graph-id iota
            ],
        ),
        compiler_params=pltpu.CompilerParams(
            dimension_semantics=("parallel", "arbitrary"),
            vmem_limit_bytes=32 * 1024 * 1024,
        ),
    )(batch_p, x_in)

    # ---- Kernel B: combine partials + phi_u MLP + residual (tiny, grid-less). ----
    out = pl.pallas_call(
        _phi_u_kernel,
        out_shape=jax.ShapeDtypeStruct((b_pad, f_u), f32),
    )(partials, u_p, w1x, w1u, b1_p, w2_p, b2_p)

    return out[:B]


def init_params(key, f_x, f_u, hidden):
    """phi_u = Linear(f_x + f_u, hidden) -> ReLU -> Linear(hidden, f_u); weights stored transposed."""
    ks = jax.random.split(key, 4)
    s = 0.1
    return {
        "w1": s * jax.random.normal(ks[0], (f_x + f_u, hidden), jnp.float32),
        "b1": s * jax.random.normal(ks[1], (hidden,), jnp.float32),
        "w2": s * jax.random.normal(ks[2], (hidden, f_u), jnp.float32),
        "b2": s * jax.random.normal(ks[3], (f_u,), jnp.float32),
    }


def reference(x, u, batch, params):
    """Pure-JAX reference of the module's forward pass."""
    B = u.shape[0]
    x_agg = jax.ops.segment_sum(x, batch, num_segments=B)
    cat = jnp.concatenate([x_agg, u], axis=1)
    h = jnp.maximum(cat @ params["w1"] + params["b1"], 0.0)
    return h @ params["w2"] + params["b2"] + u


if __name__ == "__main__":
    key = jax.random.PRNGKey(0)
    k_x, k_u, k_p, k_x2, k_u2, k_b2, k_p2 = jax.random.split(key, 7)

    # --- Test 1: small shapes implied by the module (single tile), strict f32 check. ---
    N, B, f_x, f_u, hidden = 16, 2, 4, 8, 16
    x = jax.random.normal(k_x, (N, f_x), jnp.float32)
    u = jax.random.normal(k_u, (B, f_u), jnp.float32)
    batch = jnp.repeat(jnp.arange(B, dtype=jnp.int32), N // B)
    params = init_params(k_p, f_x, f_u, hidden)

    out = jax.block_until_ready(res_global_model_node_only(x, u, batch, params))
    ref = reference(x, u, batch, params)
    assert out.shape == (B, f_u)
    assert jnp.allclose(out, ref, atol=1e-5, rtol=1e-4), float(jnp.max(jnp.abs(out - ref)))

    # --- Test 2: multi-tile / dual-range path (ragged last tile + clamped tail tile). ---
    N2, B2, f_x2, f_u2, hidden2 = 1100, 3, 5, 7, 32
    x2 = jax.random.normal(k_x2, (N2, f_x2), jnp.float32)
    u2 = jax.random.normal(k_u2, (B2, f_u2), jnp.float32)
    batch2 = jax.random.randint(k_b2, (N2,), 0, B2, dtype=jnp.int32)
    params2 = init_params(k_p2, f_x2, f_u2, hidden2)

    out2 = jax.block_until_ready(
        res_global_model_node_only(x2, u2, batch2, params2, tile_rows=256))
    ref2 = reference(x2, u2, batch2, params2)
    assert out2.shape == (B2, f_u2)
    assert jnp.allclose(out2, ref2, atol=1e-3, rtol=1e-3), float(jnp.max(jnp.abs(out2 - ref2)))

    print("KERNEL_OK")
</pallas_src>

<mosaic_0001>
module attributes {stable_mosaic.version = 11 : i64} {
  func.func @_aggregate_kernel(%arg0: i32, %arg1: i32, %arg2: memref<1x16xi32, #tpu.memory_space<vmem>>, %arg3: memref<16x4xf32, #tpu.memory_space<vmem>>, %arg4: memref<1x8x4xf32, #tpu.memory_space<vmem>>, %arg5: memref<8x4xf32, #tpu.memory_space<vmem>>, %arg6: memref<8x16xi32, #tpu.memory_space<vmem>>) attributes {dimension_semantics = [#tpu.dimension_semantics<parallel>, #tpu.dimension_semantics<arbitrary>], iteration_bounds = array<i64: 1, 1>, scalar_prefetch = 0 : i64, scratch_operands = 2 : i64, tpu.core_type = #tpu.core_type<tc>, window_params = [{transform_indices = @transform_0, window_bounds = array<i64: 1, 16>}, {transform_indices = @transform_1, window_bounds = array<i64: 16, 4>}, {transform_indices = @transform_2, window_bounds = array<i64: 1, 8, 4>}]} {
    %c0_i32 = arith.constant 0 : i32
    %0 = arith.cmpi eq, %arg1, %c0_i32 : i32
    %1 = arith.extui %0 : i1 to i32
    %c0_i32_0 = arith.constant 0 : i32
    %2 = arith.cmpi ne, %1, %c0_i32_0 : i32
    scf.if %2 {
      %cst_14 = arith.constant 0.000000e+00 : f32
      %30 = vector.broadcast %cst_14 : f32 to vector<8x4xf32>
      %c0_15 = arith.constant 0 : index
      %c0_16 = arith.constant 0 : index
      %31 = vector.load %arg5[%c0_15, %c0_16] : memref<8x4xf32, #tpu.memory_space<vmem>>, vector<8x4xf32>
      tpu.vector_store %arg5[%c0_15, %c0_16], %30 {strides = array<i32>} : memref<8x4xf32, #tpu.memory_space<vmem>>, vector<8x4xf32>,
      %32 = tpu.iota {dimensions = array<i32: 0>} : vector<8x16xi32>
      %c0_17 = arith.constant 0 : index
      %c0_18 = arith.constant 0 : index
      %33 = vector.load %arg6[%c0_17, %c0_18] : memref<8x16xi32, #tpu.memory_space<vmem>>, vector<8x16xi32>
      tpu.vector_store %arg6[%c0_17, %c0_18], %32 {strides = array<i32>} : memref<8x16xi32, #tpu.memory_space<vmem>>, vector<8x16xi32>,
    } else {
    }
    %c1_i32 = arith.constant 1 : i32
    %3 = arith.muli %arg0, %c1_i32 : i32
    %4 = arith.addi %3, %arg1 : i32
    %c16_i32 = arith.constant 16 : i32
    %5 = arith.muli %4, %c16_i32 : i32
    %6 = tpu.iota {dimensions = array<i32: 0>} : vector<16x1xi32>
    %7 = vector.broadcast %5 : i32 to vector<16x1xi32>
    %8 = arith.addi %7, %6 : vector<16x1xi32>
    %c16_i32_1 = arith.constant 16 : i32
    %9 = vector.broadcast %c16_i32_1 : i32 to vector<16x1xi32>
    %10 = arith.cmpi slt, %8, %9 : vector<16x1xi32>
    %c0 = arith.constant 0 : index
    %c0_2 = arith.constant 0 : index
    %11 = vector.load %arg3[%c0, %c0_2] : memref<16x4xf32, #tpu.memory_space<vmem>>, vector<16x4xf32>
    %c0_i32_3 = arith.constant 0 : i32
    %12 = arith.sitofp %c0_i32_3 : i32 to f32
    %13 = vector.shape_cast %10 : vector<16x1xi1> to vector<16x1xi1>
    %14 = vector.broadcast %13 : vector<16x1xi1> to vector<16x4xi1>
    %15 = vector.broadcast %12 : f32 to vector<16x4xf32>
    %16 = arith.select %14, %11, %15 : vector<16x4xi1>, vector<16x4xf32>
    %c0_4 = arith.constant 0 : index
    %c0_5 = arith.constant 0 : index
    %17 = vector.load %arg2[%c0_4, %c0_5] : memref<1x16xi32, #tpu.memory_space<vmem>>, vector<1x16xi32>
    %c0_6 = arith.constant 0 : index
    %c0_7 = arith.constant 0 : index
    %18 = vector.load %arg6[%c0_6, %c0_7] : memref<8x16xi32, #tpu.memory_space<vmem>>, vector<8x16xi32>
    %19 = vector.broadcast %17 : vector<1x16xi32> to vector<8x16xi32>
    %20 = arith.cmpi eq, %18, %19 : vector<8x16xi32>
    %21 = arith.extui %20 : vector<8x16xi1> to vector<8x16xi32>
    %22 = arith.sitofp %21 : vector<8x16xi32> to vector<8x16xf32>
    %c0_8 = arith.constant 0 : index
    %c0_9 = arith.constant 0 : index
    %23 = vector.load %arg5[%c0_8, %c0_9] : memref<8x4xf32, #tpu.memory_space<vmem>>, vector<8x4xf32>
    %cst = arith.constant dense<0.000000e+00> : vector<8x4xf32>
    %24 = tpu.matmul %22, %16, %cst {dimension_numbers = #tpu.dot_dimension_numbers<[1], [0], [0], [1], [0, 0, 1, 1], [], []>} : vector<8x16xf32>, vector<16x4xf32>, vector<8x4xf32> -> vector<8x4xf32>
    %25 = arith.addf %23, %24 : vector<8x4xf32>
    %c0_10 = arith.constant 0 : index
    %c0_11 = arith.constant 0 : index
    %26 = vector.load %arg5[%c0_10, %c0_11] : memref<8x4xf32, #tpu.memory_space<vmem>>, vector<8x4xf32>
    tpu.vector_store %arg5[%c0_10, %c0_11], %25 {strides = array<i32>} : memref<8x4xf32, #tpu.memory_space<vmem>>, vector<8x4xf32>,
    %c0_i32_12 = arith.constant 0 : i32
    %27 = arith.cmpi eq, %arg1, %c0_i32_12 : i32
    %28 = arith.extui %27 : i1 to i32
    %c0_i32_13 = arith.constant 0 : i32
    %29 = arith.cmpi ne, %28, %c0_i32_13 : i32
    scf.if %29 {
      %c0_14 = arith.constant 0 : index
      %c0_15 = arith.constant 0 : index
      %30 = vector.load %arg5[%c0_14, %c0_15] : memref<8x4xf32, #tpu.memory_space<vmem>>, vector<8x4xf32>
      %31 = vector.shape_cast %30 : vector<8x4xf32> to vector<1x8x4xf32>
      %c0_16 = arith.constant 0 : index
      %c0_17 = arith.constant 0 : index
      %c0_18 = arith.constant 0 : index
      %32 = vector.load %arg4[%c0_16, %c0_17, %c0_18] : memref<1x8x4xf32, #tpu.memory_space<vmem>>, vector<1x8x4xf32>
      tpu.vector_store %arg4[%c0_16, %c0_17, %c0_18], %31 {strides = array<i32>} : memref<1x8x4xf32, #tpu.memory_space<vmem>>, vector<1x8x4xf32>,
    } else {
    }
    return
  }
  func.func @transform_0(%arg0: i32, %arg1: i32) -> (i32, i32) {
    %c1_i32 = arith.constant 1 : i32
    %0 = arith.muli %arg0, %c1_i32 : i32
    %1 = arith.addi %0, %arg1 : i32
    %c0_i32 = arith.constant 0 : i32
    %c0_i32_0 = arith.constant 0 : i32
    return %c0_i32, %1 : i32, i32
  }
  func.func @transform_1(%arg0: i32, %arg1: i32) -> (i32, i32) {
    %c1_i32 = arith.constant 1 : i32
    %0 = arith.muli %arg0, %c1_i32 : i32
    %1 = arith.addi %0, %arg1 : i32
    %c0_i32 = arith.constant 0 : i32
    %2 = arith.minsi %1, %c0_i32 : i32
    %c0_i32_0 = arith.constant 0 : i32
    %c0_i32_1 = arith.constant 0 : i32
    return %2, %c0_i32_0 : i32, i32
  }
  func.func @transform_2(%arg0: i32, %arg1: i32) -> (i32, i32, i32) {
    %c0_i32 = arith.constant 0 : i32
    %c0_i32_0 = arith.constant 0 : i32
    %c0_i32_1 = arith.constant 0 : i32
    return %arg0, %c0_i32, %c0_i32_0 : i32, i32, i32
  }
}

</mosaic_0001>

<bundles_post_ra>
// kernel: tpu_custom_call.1
= control target key start
LH: loop header
LB: loop body
LE: loop exit
PB: predicated region body
PF: predicated region fallthrough
CT: control target
= control target key end

     0   :  { %vm61_vm0 = vcmask 31744   ;;  %v63_v0 = vlaneseq  ;;  %v141_v3 = vmov 0.0   ;;  %vm65_vm1 = vcmask 130048   ;;  %s172_s1 = inlined_call_operand.vmem [shape: f32[16,4], index: 1, kind: input, shape index: {}]   ;;  %s173_s0 = inlined_call_operand.vmem [shape: s32[1,16], index: 0, kind: input, shape index: {}]   ;;  %s174_s2 = inlined_call_operand.vmem [shape: f32[1,8,4], index: 2, kind: output, shape index: {}]  }
   0x1   :  { %v78_v1 = vld [vmem:[%s172_s1 + $0x8] sm:$0xff]  ;;  %v77_v2 = vld [vmem:[%s172_s1] sm:$0xff]  ;;  %62 = vst.msk [vmem:[#allocation2] sm:$0xff] %vm61_vm0, %v141_v3 }
   0x2   :  { %110 = vmatpush.msra.mxu0 %v78_v1  ;;  %v64_v4 = vshrl.u32 %v63_v0, 7  ;;  %v140_v5 = vld [vmem:[%s173_s0] ss:$0 sm:$0xff] }
   0x4   :  { %111 = vmatpush.msra.mxu0 %v77_v2  ;;  %66 = vst.msk [vmem:[#allocation3] sm:$0xff] %vm65_vm1, %v64_v4 }
   0x8   :  { %v91_v8 = vld [vmem:[#allocation2] sm:$0xff] }
   0xb   :  { %v86_v6 = vld [vmem:[#allocation3] sm:$0xff] }
   0xc   :  { %vm88_vm2 = vcmp.eq.s32.totalorder %v86_v6, %v140_v5 }
   0xd   :  { %v137_v7 = vsel %vm88_vm2, 1.0, %v141_v3 }
   0xe   :  { %138 = vmatmul.msk.f32.vlgmr.msra.gmra.mxu0 %vm65_vm1, %v137_v7 }
  0x8b   :  { %v113_v9 = vpop.f32.mrf.mxu0 }
  0x8c   :  { %v116_v10 = vadd.f32 %v113_v9, %v91_v8 }
  0x8e   :  { %118 = vst.msk [vmem:[#allocation2] sm:$0xff] %vm61_vm0, %v116_v10 }
  0x95   :  { %v122_v11 = vld [vmem:[#allocation2] sm:$0xff] }
  0x96   :  { %123 = vst.msk [vmem:[%s174_s2] sm:$0xff] %vm61_vm0, %v122_v11 }

</bundles_post_ra>
